<compile_context>
chip_gen: v6e
topology: v6e:2x2x1
jax: 0.10.0
libtpu: 0.0.40
codegen_flags: <defaults>
</compile_context>

<pallas_src>
import functools

import jax
import jax.numpy as jnp
from jax import lax
from jax.experimental import pallas as pl
from jax.experimental.pallas import tpu as pltpu

_LANE = 128
_SUBLANE = 8
_CHUNK_ROWS = 64                       # 64x128 f32 = 8 vregs per input per loop step
_MAX_BLOCK_BYTES = 2 * 1024 * 1024     # per-input per-grid-step block size target


def _min_sublane_rows(dtype):
    """Minimum second-to-last block dim for the TPU tile of this dtype."""
    return {4: 8, 2: 16, 1: 32}.get(jnp.dtype(dtype).itemsize, 8)


def _round_up(v, m):
    return ((v + m - 1) // m) * m


def _focal_bce_partial_kernel(x_ref, t_ref, o_ref, *, block_rows, chunk_rows,
                              valid_rows_last, needs_mask):
    """One grid step: sum of stable BCE-with-logits over a (block_rows, 128)
    tile, streamed chunk-by-chunk into a single (8, 128) f32 accumulator."""
    if needs_mask:
        # Last block may overhang the array; mask its invalid rows only.
        last = pl.num_programs(0) - 1
        valid_rows = jnp.where(pl.program_id(0) == last,
                               jnp.int32(valid_rows_last),
                               jnp.int32(block_rows))
    else:
        valid_rows = None

    def chunk_partial(row0, nrows):
        x = x_ref[pl.ds(row0, nrows), :].astype(jnp.float32)
        t = t_ref[pl.ds(row0, nrows), :].astype(jnp.float32)
        # Numerically stable BCE with logits (matches PyTorch):
        #   l = max(x, 0) - x*t + log1p(exp(-|x|))
        bce = jnp.maximum(x, 0.0) - x * t + jnp.log1p(jnp.exp(-jnp.abs(x)))
        if valid_rows is not None:
            rid = lax.broadcasted_iota(jnp.int32, (nrows, _LANE), 0) + row0
            bce = jnp.where(rid < valid_rows, bce, 0.0)
        # Fold the chunk down to one (8, 128) vreg tile using VPU adds only.
        return bce.reshape(nrows // _SUBLANE, _SUBLANE, _LANE).sum(axis=0)

    num_full = block_rows // chunk_rows
    rem_rows = block_rows - num_full * chunk_rows

    acc = jnp.zeros((_SUBLANE, _LANE), jnp.float32)
    if num_full == 1:
        acc = acc + chunk_partial(0, chunk_rows)
    elif num_full > 1:
        def body(c, a):
            row0 = pl.multiple_of(c * chunk_rows, chunk_rows)
            return a + chunk_partial(row0, chunk_rows)
        acc = lax.fori_loop(0, num_full, body, acc)
    if rem_rows > 0:
        acc = acc + chunk_partial(num_full * chunk_rows, rem_rows)

    o_ref[0] = acc


def focal_loss(inputs, targets, alpha=1.0, gamma=2.0):
    """Pallas TPU implementation of FocalLoss.forward."""
    assert inputs.shape == targets.shape
    n = int(inputs.size)

    min_rows = _min_sublane_rows(inputs.dtype)
    align_elems = min_rows * _LANE
    prefix_n = (n // align_elems) * align_elems   # tile-aligned prefix
    tail_n = n - prefix_n                         # < min_rows*128 elements

    x_flat = inputs.reshape(-1)
    t_flat = targets.reshape(-1)

    total = jnp.float32(0.0)

    if prefix_n > 0:
        if tail_n > 0:
            # Ragged tail: kernel runs on the aligned prefix only. (A fully
            # copy-free ragged path would need 1-D blocks / manual DMA; the
            # prefix slice is the only remaining copy and only on ragged n.)
            x2d = x_flat[:prefix_n].reshape(-1, _LANE)
            t2d = t_flat[:prefix_n].reshape(-1, _LANE)
        else:
            x2d = x_flat.reshape(-1, _LANE)   # free reshape, zero extra HBM traffic
            t2d = t_flat.reshape(-1, _LANE)
        rows = prefix_n // _LANE              # multiple of min_rows

        # Dtype-aware block size: ~2 MiB per input per grid step
        # (2 inputs x 2 pipeline buffers = 8 MiB VMEM on every generation).
        itemsize = jnp.dtype(inputs.dtype).itemsize
        max_block_rows = max(
            min_rows,
            (_MAX_BLOCK_BYTES // (_LANE * itemsize)) // min_rows * min_rows)
        block_rows = min(max_block_rows, rows)
        nblocks = pl.cdiv(rows, block_rows)

        # v7x megacore: prefer >= 2 (and even) blocks so both TensorCores
        # share the stream; on single-TC v5e/v6e this is harmless.
        if nblocks == 1 and rows >= 2 * min_rows:
            block_rows = _round_up(pl.cdiv(rows, 2), min_rows)
            nblocks = pl.cdiv(rows, block_rows)
        elif nblocks > 1 and nblocks % 2 == 1:
            block_rows = _round_up(pl.cdiv(rows, nblocks + 1), min_rows)
            nblocks = pl.cdiv(rows, block_rows)

        valid_rows_last = rows - (nblocks - 1) * block_rows
        needs_mask = valid_rows_last != block_rows
        chunk_rows = min(_CHUNK_ROWS, block_rows)

        kernel = functools.partial(
            _focal_bce_partial_kernel,
            block_rows=int(block_rows),
            chunk_rows=int(chunk_rows),
            valid_rows_last=int(valid_rows_last),
            needs_mask=bool(needs_mask),
        )

        partials = pl.pallas_call(
            kernel,
            out_shape=jax.ShapeDtypeStruct((nblocks, _SUBLANE, _LANE),
                                           jnp.float32),
            grid=(nblocks,),
            in_specs=[
                pl.BlockSpec((block_rows, _LANE), lambda i: (i, 0)),
                pl.BlockSpec((block_rows, _LANE), lambda i: (i, 0)),
            ],
            out_specs=pl.BlockSpec((1, _SUBLANE, _LANE), lambda i: (i, 0, 0)),
            compiler_params=pltpu.CompilerParams(
                dimension_semantics=("parallel",)),
        )(x2d, t2d)
        total = total + jnp.sum(partials)

    if tail_n > 0:
        # Tiny ragged tail (< min_rows*128 elems): plain JAX, negligible cost.
        xt = x_flat[prefix_n:].astype(jnp.float32)
        tt = t_flat[prefix_n:].astype(jnp.float32)
        total = total + jnp.sum(
            jnp.maximum(xt, 0.0) - xt * tt + jnp.log1p(jnp.exp(-jnp.abs(xt))))

    mean_bce = total / jnp.float32(n)
    return alpha * (1.0 - jnp.exp(-mean_bce)) ** gamma * mean_bce


def _focal_loss_ref(inputs, targets, alpha=1.0, gamma=2.0):
    """Pure-JAX reference matching the PyTorch module."""
    x = inputs.astype(jnp.float32)
    t = targets.astype(jnp.float32)
    bce = jnp.mean(jnp.maximum(x, 0.0) - x * t + jnp.log1p(jnp.exp(-jnp.abs(x))))
    return alpha * (1.0 - jnp.exp(-bce)) ** gamma * bce


if __name__ == "__main__":
    key = jax.random.PRNGKey(0)
    k1, k2, k3, k4, k5, k6 = jax.random.split(key, 6)

    # 1) Small NCHW-like case, divides evenly -> pure fast path, 2 blocks.
    shape = (2, 4, 16, 16)
    logits = jax.random.normal(k1, shape, dtype=jnp.float32)
    targets = (jax.random.uniform(k2, shape) > 0.5).astype(jnp.float32)
    loss = jax.block_until_ready(focal_loss(logits, targets, alpha=1.0, gamma=2.0))
    ref = _focal_loss_ref(logits, targets, alpha=1.0, gamma=2.0)
    assert jnp.allclose(loss, ref, rtol=1e-5, atol=1e-6), (loss, ref)

    # 2) Ragged total size -> aligned-prefix kernel + JAX tail epilogue.
    shape2 = (2, 4, 17, 17)
    logits2 = jax.random.normal(k3, shape2, dtype=jnp.float32)
    targets2 = (jax.random.uniform(k4, shape2) > 0.5).astype(jnp.float32)
    loss2 = jax.block_until_ready(focal_loss(logits2, targets2, alpha=1.0, gamma=2.0))
    ref2 = _focal_loss_ref(logits2, targets2, alpha=1.0, gamma=2.0)
    assert jnp.allclose(loss2, ref2, rtol=1e-5, atol=1e-6), (loss2, ref2)

    # 3) rows % block_rows != 0 -> exercises the in-kernel last-block row mask.
    shape3 = (2, 4, 16, 24)
    logits3 = jax.random.normal(k5, shape3, dtype=jnp.float32)
    targets3 = (jax.random.uniform(k6, shape3) > 0.5).astype(jnp.float32)
    loss3 = jax.block_until_ready(focal_loss(logits3, targets3, alpha=1.0, gamma=2.0))
    ref3 = _focal_loss_ref(logits3, targets3, alpha=1.0, gamma=2.0)
    assert jnp.allclose(loss3, ref3, rtol=1e-5, atol=1e-6), (loss3, ref3)

    # 4) bf16 inputs -> dtype-aware (16,128) tile alignment (upcast in-kernel,
    #    like the module's inputs.float()).
    logits4 = logits.astype(jnp.bfloat16)
    targets4 = targets.astype(jnp.bfloat16)
    loss4 = jax.block_until_ready(focal_loss(logits4, targets4, alpha=1.0, gamma=2.0))
    ref4 = _focal_loss_ref(logits4, targets4, alpha=1.0, gamma=2.0)
    assert jnp.allclose(loss4, ref4, rtol=1e-5, atol=1e-6), (loss4, ref4)

    print("KERNEL_OK")
</pallas_src>

<mosaic_0001>
module attributes {stable_mosaic.version = 11 : i64} {
  func.func @_focal_bce_partial_kernel(%arg0: i32, %arg1: memref<8x128xf32, #tpu.memory_space<vmem>>, %arg2: memref<8x128xf32, #tpu.memory_space<vmem>>, %arg3: memref<1x8x128xf32, #tpu.memory_space<vmem>>) attributes {dimension_semantics = [#tpu.dimension_semantics<parallel>], iteration_bounds = array<i64: 2>, scalar_prefetch = 0 : i64, scratch_operands = 0 : i64, tpu.core_type = #tpu.core_type<tc>, window_params = [{transform_indices = @transform_0, window_bounds = array<i64: 8, 128>}, {transform_indices = @transform_1, window_bounds = array<i64: 8, 128>}, {transform_indices = @transform_2, window_bounds = array<i64: 1, 8, 128>}]} {
    %cst = arith.constant 0.000000e+00 : f32
    %0 = vector.broadcast %cst : f32 to vector<8x128xf32>
    %c0 = arith.constant 0 : index
    %c0_0 = arith.constant 0 : index
    %1 = vector.load %arg1[%c0, %c0_0] : memref<8x128xf32, #tpu.memory_space<vmem>>, vector<8x128xf32>
    %c0_1 = arith.constant 0 : index
    %c0_2 = arith.constant 0 : index
    %2 = vector.load %arg2[%c0_1, %c0_2] : memref<8x128xf32, #tpu.memory_space<vmem>>, vector<8x128xf32>
    %cst_3 = arith.constant 0.000000e+00 : f32
    %3 = vector.broadcast %cst_3 : f32 to vector<8x128xf32>
    %4 = arith.maximumf %1, %3 : vector<8x128xf32>
    %5 = arith.mulf %1, %2 : vector<8x128xf32>
    %6 = arith.subf %4, %5 : vector<8x128xf32>
    %7 = math.absf %1 : vector<8x128xf32>
    %cst_4 = arith.constant 0.000000e+00 : f32
    %8 = vector.broadcast %cst_4 : f32 to vector<8x128xf32>
    %9 = arith.subf %8, %7 : vector<8x128xf32>
    %10 = math.exp %9 : vector<8x128xf32>
    %11 = math.log1p %10 : vector<8x128xf32>
    %12 = arith.addf %6, %11 : vector<8x128xf32>
    %13 = vector.shape_cast %12 : vector<8x128xf32> to vector<1x8x128xf32>
    %cst_5 = arith.constant dense<0.000000e+00> : vector<8x128xf32>
    %14 = vector.multi_reduction <add>, %13, %cst_5 [0] : vector<1x8x128xf32> to vector<8x128xf32>
    %15 = arith.addf %0, %14 : vector<8x128xf32>
    %c0_6 = arith.constant 0 : index
    %c0_7 = arith.constant 0 : index
    %c0_8 = arith.constant 0 : index
    %16 = vector.load %arg3[%c0_6, %c0_7, %c0_8] : memref<1x8x128xf32, #tpu.memory_space<vmem>>, vector<1x8x128xf32>
    %17 = vector.shape_cast %16 : vector<1x8x128xf32> to vector<8x128xf32>
    %18 = vector.shape_cast %15 : vector<8x128xf32> to vector<1x8x128xf32>
    tpu.vector_store %arg3[%c0_6, %c0_7, %c0_8], %18 {strides = array<i32>} : memref<1x8x128xf32, #tpu.memory_space<vmem>>, vector<1x8x128xf32>,
    return
  }
  func.func @transform_0(%arg0: i32) -> (i32, i32) {
    %c0_i32 = arith.constant 0 : i32
    %c0_i32_0 = arith.constant 0 : i32
    return %arg0, %c0_i32 : i32, i32
  }
  func.func @transform_1(%arg0: i32) -> (i32, i32) {
    %c0_i32 = arith.constant 0 : i32
    %c0_i32_0 = arith.constant 0 : i32
    return %arg0, %c0_i32 : i32, i32
  }
  func.func @transform_2(%arg0: i32) -> (i32, i32, i32) {
    %c0_i32 = arith.constant 0 : i32
    %c0_i32_0 = arith.constant 0 : i32
    %c0_i32_1 = arith.constant 0 : i32
    return %arg0, %c0_i32, %c0_i32_0 : i32, i32, i32
  }
}

</mosaic_0001>

<bundles_post_ra>
// kernel: tpu_custom_call.1
= control target key start
LH: loop header
LB: loop body
LE: loop exit
PB: predicated region body
PF: predicated region fallthrough
CT: control target
= control target key end

     0   :  { %7 = vsyncpa [#allocation3], 0  ;;  %s738_s0 = inlined_call_operand.hbm [shape: f32[16,128], index: 0, kind: input, shape index: {}]   ;;  %s739_s1 = inlined_call_operand.hbm [shape: f32[16,128], index: 1, kind: input, shape index: {}]   ;;  %s740_s2 = inlined_call_operand.hbm [shape: f32[2,8,128], index: 2, kind: output, shape index: {}]  }
   0x1   :  { %9 = vsyncpa [#allocation3 + $0x1], 0 }
   0x2   :  { %10 = vsyncpa [#allocation6], 0 }
   0x3   :  { %12 = vsyncpa [#allocation6 + $0x1], 0 }
   0x4   :  { %13 = vsyncpa [#allocation4], 0 }
   0x5   :  { %15 = vsyncpa [#allocation4 + $0x1], 0  ;;  %s539_s9 = smov 0   ;;  %s541_s10 = smov 0  }
   0x6   :  { %s543_s11 = smov 0   ;;  %s545_s12 = smov 0  }
   0x7 LB: > { %s560_s13 = sadd.s32 4294967295, %s519_s12   ;;  %s325_s14 = sadd.s32 4294967294, %s519_s12   ;;  %s519_s12 = sphi %s545_s12, %s759_s12   ;;  %s515_s11 = sphi %s543_s11, %s758_s11   ;;  %s511_s10 = sphi %s541_s10, %s757_s10   ;;  %s507_s9 = sphi %s539_s9, %s756_s9  }
   0x8   : > { %s564_s15 = sadd.s32 1, %s519_s12   ;;  %s28_s16 = sadd.s32 1, %s515_s11 }
   0x9   : > { %s25_s17 = ssub.s32 %s519_s12, %s564_s15  ;;  %p35_p0 = scmp.ne.s32.totalorder %s515_s11, %s511_s10 }
   0xa   : > { %p26_p1 = scmp.eq.s32.totalorder %s25_s17, 0  ;;  %p36_p2 = scmp.eq.s32.totalorder %s519_s12, 0 }
   0xb   : > { %p41_p3 = scmp.ne.s32.totalorder %s511_s10, %s507_s9  ;;  %p42_p4 = scmp.eq.s32.totalorder %s560_s13, 0 }
   0xc   : > { %s576_s18 = scalar_select %p26_p1, %s515_s11, %s28_s16  }
   0xd   : > { %p578_p5 = por %p36_p2, %p35_p0  ;;  %p582_p6 = por %p42_p4, %p41_p3 }
   0xe   : > { %p91_p7 = scmp.eq.s32.totalorder %s560_s13, 1  ;;  %p97_p8 = scmp.eq.s32.totalorder %s325_s14, 1 }
   0xf   : > { %s744_s20 = scalar_select %p582_p6, 1, 0 }
  0x10   : > { %p357_p10 = scmp.lt.s32.totalorder %s519_s12, 2  ;;  %p589_p11 = por %p91_p7, %p35_p0 }
  0x11   : > { %p593_p12 = por %p97_p8, %p41_p3  ;;  %s598_s23 = sand.u32 1, %s515_s11  }
  0x12   : > { %s745_s21 = scalar_select %p589_p11, 1, 0 }
  0x13   : > { %s746_s22 = scalar_select %p593_p12, 1, 0 }
  0x14   : > { %s329_s24 = sshll.u32 %s519_s12, 7  ;;  %s328_s25 = sshll.u32 %s598_s23, 3 }
  0x15   : > { %s607_s28 = scalar_lea.hbm %s738_s0, %s329_s24  ;;  %s121_s29 = scalar_lea.vmem [#allocation2], %s328_s25 }
  0x16   : > { %s128_s30 = sshll.u32 %s121_s29, 4  ;;  %p613_p13 = pnand %p357_p10, %p578_p5  ;;  %s617_s30 = int_to_ptr.vmem [resolvable:$true] %s128_s30 }
  0x17   : > { %s118_s4 = scalar_lea.sflag [#allocation3], %s598_s23  ;;  %s395_s5 = scalar_lea.hbm %s607_s28, 128 }
  0x18   : > { %p396_p2 = scmp.ne.s32.totalorder %s607_s28, %s395_s5  ;;  %p397_p3 = pneg %p613_p13 }
  0x19   : > { %s400_s8 = scalar_lea.hbm %s738_s0, 256  ;;  %p401_p5 = scmp.lt.s32.totalorder %s607_s28, %s738_s0 }
  0x1a   : > { %p398_p4 = pnand %p397_p3, %p396_p2  ;;  %p402_p8 = scmp.lt.s32.totalorder %s400_s8, %s395_s5 }
  0x1c   : > { %p399_p7 = pneg %p398_p4  ;;  %p403_p10 = por %p402_p8, %p401_p5 }
  0x1e   : > { %p404_p9 = pnand %p403_p10, %p399_p7 }
  0x20   : > { %407 = shalt.err (!%p404_p9)
}
  0x21   : > { %s408_s17 = scalar_lea.vmem %s617_s30, 128  ;;  %s521_s19 = smov [#allocation2]  }
  0x22   : > { %p409_p0 = scmp.ne.s32.totalorder %s617_s30, %s408_s17  ;;  %s413_s26 = sshll.u32 %s521_s19, 4  ;;  %s414_s26 = int_to_ptr.vmem [resolvable:$false] %s413_s26 }
  0x23   : > { %s415_s27 = scalar_lea.vmem %s414_s26, 256  ;;  %p416_p1 = scmp.lt.s32.totalorder %s617_s30, %s414_s26 }
  0x24   : > { %p411_p2 = pnand %p409_p0, %p397_p3  ;;  %p417_p12 = scmp.lt.s32.totalorder %s415_s27, %s408_s17 }
  0x26   : > { %p412_p4 = pneg %p411_p2  ;;  %p418_p11 = por %p417_p12, %p416_p1 }
  0x28   : > { %p419_p5 = pnand %p418_p11, %p412_p4 }
  0x2a   : > { %422 = shalt.err (!%p419_p5)
}
  0x2b   : > { %349 = dma.hbm_to_vmem [thread:$0]  (!%p613_p13), %s607_s28, 128, %s617_s30, %s118_s4  }
  0x2c   : > { %p748_p9 = scmp.lt.s32.totalorder %s519_s12, 3  ;;  %p749_p0 = scmp.ge.s32.totalorder %s519_s12, 1 }
  0x2d   : > { %s659_s7 = scalar_lea.hbm %s739_s1, %s329_s24  ;;  %s139_s8 = scalar_lea.vmem [#allocation5], %s328_s25 }
  0x2e   : > { %p650_p7 = pnand %p749_p0, %p748_p9  ;;  %s146_s14 = sshll.u32 %s139_s8, 4  ;;  %s147_s14 = int_to_ptr.vmem [resolvable:$true] %s146_s14 }
  0x2f   : > { %s136_s28 = scalar_lea.sflag [#allocation6], %s598_s23  ;;  %s423_s30 = scalar_lea.hbm %s659_s7, 128 }
  0x30   : > { %s750_s29 = scalar_select %p650_p7, 1, 0 }
  0x31   : > { %p424_p11 = scmp.ne.s32.totalorder %s659_s7, %s423_s30  ;;  %s428_s17 = scalar_lea.hbm %s739_s1, 256 }
  0x32   : > { %p429_p8 = scmp.lt.s32.totalorder %s659_s7, %s739_s1  ;;  %p430_p10 = scmp.lt.s32.totalorder %s428_s17, %s423_s30 }
  0x33   : > { %p426_p12 = pnand %p424_p11, %p397_p3 }
  0x34   : > { %p431_p2 = por %p430_p10, %p429_p8 }
  0x35   : > { %p427_p1 = pneg %p426_p12 }
  0x37   : > { %p432_p4 = pnand %p431_p2, %p427_p1 }
  0x39   : > { %435 = shalt.err (!%p432_p4)
}
  0x3a   : > { %s436_s25 = scalar_lea.vmem %s147_s14, 128  ;;  %s522_s23 = smov [#allocation5]  }
  0x3b   : > { %p437_p5 = scmp.ne.s32.totalorder %s147_s14, %s436_s25  ;;  %s441_s26 = sshll.u32 %s522_s23, 4  ;;  %s442_s26 = int_to_ptr.vmem [resolvable:$false] %s441_s26 }
  0x3c   : > { %s443_s27 = scalar_lea.vmem %s442_s26, 256  ;;  %p444_p11 = scmp.lt.s32.totalorder %s147_s14, %s442_s26 }
  0x3d   : > { %p439_p9 = pnand %p437_p5, %p397_p3  ;;  %p445_p12 = scmp.lt.s32.totalorder %s443_s27, %s436_s25 }
  0x3f   : > { %p440_p0 = pneg %p439_p9  ;;  %p446_p6 = por %p445_p12, %p444_p11 }
  0x41   : > { %p447_p7 = pnand %p446_p6, %p440_p0 }
  0x43   : > { %450 = shalt.err (!%p447_p7)
}
  0x44   : > { %352 = dma.hbm_to_vmem [thread:$0]  (!%p613_p13), %s659_s7, 128, %s147_s14, %s136_s28  }
  0x45   : > { %p751_p1 = scmp.ne.s32.totalorder %s750_s29, 0 }
  0x46   : > { %s685_s5 = sand.u32 (!%p751_p1), 1, %s511_s10   ;;  %p752_p6 = scmp.ne.s32.totalorder (!%p751_p1), %s744_s20, 0 }
  0x47   : > { %155 = sbr.rel (%p751_p1) target bundleno = 134 (0x86), region = 28  ;;  %s688_s6 = sshll.u32 (!%p751_p1), %s685_s5, 3 }
  0x48   : > { %s158_s8 = scalar_lea.sflag (!%p751_p1), [#allocation3], %s685_s5  ;;  %s161_s30 = scalar_lea.vmem (!%p751_p1), [#allocation2], %s688_s6 }
  0x4c   : > { %494 = dma.done.wait (%p752_p6), %s158_s8, 128  }
  0x4d   : > { %496 = vsyncadd (%p752_p6), %s158_s8, 4294967168  ;;  %s167_s3 = scalar_lea.sflag [#allocation6], %s685_s5  ;;  %s170_s29 = scalar_lea.vmem [#allocation5], %s688_s6 }
  0x4e   : > { %498 = dma.done.wait (%p752_p6), %s167_s3, 128  }
  0x4f   : > { %500 = vsyncadd (%p752_p6), %s167_s3, 4294967168  ;;  %v196_v0 = vld [vmem:[%s161_s30] sm:$0xff]  ;;  %v197_v7 = vld [vmem:[%s170_s29] sm:$0xff]  ;;  %s195_s20 = scalar_lea.vmem [#allocation7], %s688_s6  ;;  %s337_s14 = sshll.u32 %s560_s13, 7 }
  0x50   : > { %v201_v1 = vand.u32 2147483647, %v196_v0  ;;  %v198_v9 = vmax.f32 %v196_v0, 0.0  ;;  %v199_v10 = vmul.f32 %v197_v7, %v196_v0  ;;  %s232_s7 = sshll.u32 %s195_s20, 4  ;;  %s230_s16 = scalar_lea.hbm %s740_s2, %s337_s14  ;;  %s233_s7 = int_to_ptr.vmem [resolvable:$true] %s232_s7 }
  0x51   : > { %s219_s17 = scalar_lea.sflag [#allocation4], %s685_s5  ;;  %s451_s24 = scalar_lea.vmem %s233_s7, 128 }
  0x52   : > { %v202_v2 = vsub.f32 0.0, %v201_v1  ;;  %v200_v14 = vsub.f32 %v198_v9, %v199_v10  ;;  %p452_p13 = scmp.ne.s32.totalorder %s233_s7, %s451_s24  ;;  %p753_p3 = scmp.ne.s32.totalorder %s745_s21, 0 }
  0x53   : > { %s523_s19 = smov [#allocation7]  }
  0x54   : > { %v203_v3 = vmul.f32 1.442695, %v202_v2  ;;  %p453_p7 = pnand %p452_p13, %p753_p3  ;;  %s455_s25 = sshll.u32 %s523_s19, 4  ;;  %s456_s25 = int_to_ptr.vmem [resolvable:$false] %s455_s25 }
  0x55   : > { %s457_s23 = scalar_lea.vmem %s456_s25, 256  ;;  %p458_p10 = scmp.lt.s32.totalorder %s233_s7, %s456_s25 }
  0x56   : > { %391 = vpow2.f32 %v203_v3  ;;  %p454_p8 = pneg %p453_p7  ;;  %p459_p2 = scmp.lt.s32.totalorder %s457_s23, %s451_s24 }
  0x58   : > { %p460_p4 = por %p459_p2, %p458_p10 }
  0x5a   : > { %p461_p5 = pnand %p460_p4, %p454_p8 }
  0x63   : > { %v392_v4 = vpop.eup %391 }
  0x64   : > { %v205_v5 = vadd.f32 1.0, %v392_v4  ;;  %v208_v6 = vmul.f32 -0.5, %v392_v4  ;;  %v211_v11 = vand.u32 2147483647, %v392_v4 }
  0x66   : > { %393 = vlog2.f32 %v205_v5  ;;  %v209_v8 = vadd.f32 1.0, %v208_v6  ;;  %vm212_vm0 = vcmp.lt.f32.partialorder %v211_v11, 0.0004427343 }
  0x68   : > { %v210_v12 = vmul.f32 %v392_v4, %v209_v8 }
  0x73   : > { %v394_v13 = vpop.eup %393 }
  0x74   : > { %v207_v15 = vmul.f32 0.6931472, %v394_v13 }
  0x76   : > { %v213_v16 = vsel %vm212_vm0, %v210_v12, %v207_v15 }
  0x77   : > { %v214_v17 = vadd.f32 %v213_v16, %v200_v14 }
  0x79   : > { %217 = vst [vmem:[%s195_s20] sm:$0xff] %v214_v17 }
  0x7a   : > { %464 = shalt.err (!%p461_p5)
}
  0x7b   : > { %s465_s13 = scalar_lea.hbm %s230_s16, 128  ;;  %s469_s5 = scalar_lea.hbm %s740_s2, 256 }
  0x7c   : > { %p466_p9 = scmp.ne.s32.totalorder %s230_s16, %s465_s13  ;;  %p470_p12 = scmp.lt.s32.totalorder %s230_s16, %s740_s2 }
  0x7d   : > { %p471_p1 = scmp.lt.s32.totalorder %s469_s5, %s465_s13 }
  0x7e   : > { %p467_p0 = pnand %p466_p9, %p753_p3 }
  0x7f   : > { %p472_p6 = por %p471_p1, %p470_p12 }
  0x80   : > { %p468_p11 = pneg %p467_p0 }
  0x82   : > { %p473_p13 = pnand %p472_p6, %p468_p11 }
  0x84   : > { %476 = shalt.err (!%p473_p13)
}
  0x85   : > { %344 = dma.vmem_to_hbm [thread:$0]  (%p753_p3), %s233_s7, 128, %s230_s16, %s219_s17  }
  0x86 PF: > { %s244_s30 = sand.u32 1, %s507_s9   ;;  %p754_p7 = scmp.ne.s32.totalorder %s746_s22, 0 }
  0x87   : > { %p755_p8 = scmp.ge.s32.totalorder %s519_s12, 2  ;;  %s245_s3 = scalar_lea.sflag [#allocation4], %s244_s30 }
  0x89   : > { %p354_p10 = pnand %p755_p8, %p754_p7 }
  0x8b   : > { %p355_p2 = pneg %p354_p10 }
  0x8d   : > { %502 = dma.done.wait (%p355_p2), %s245_s3, 128  }
  0x8e   : > { %504 = vsyncadd (%p355_p2), %s245_s3, 4294967168  ;;  %p18_p4 = scmp.ge.s32.totalorder %s564_s15, 4   ;;  %s756_s9 = smov %s511_s10 }
  0x8f   : > { %s757_s10 = smov %s515_s11  ;;  %s758_s11 = smov %s576_s18 }
  0x90   : > { %s759_s12 = smov %s564_s15  ;;  %20 = sbr.rel (!%p18_p4) target bundleno = 7 (0x7), region = 86 }
  0x95   :  { %250 = vsyncpa [#allocation3], 1 }
  0x96   :  { %252 = vsyncpa [#allocation3 + $0x1], 1 }
  0x97   :  { %253 = vsyncpa [#allocation6], 1 }
  0x98   :  { %255 = vsyncpa [#allocation6 + $0x1], 1 }
  0x99   :  { %256 = vsyncpa [#allocation4], 1 }
  0x9a   :  { %258 = vsyncpa [#allocation4 + $0x1], 1 }

</bundles_post_ra>
